<compile_context>
chip_gen: v7x
topology: tpu7x:2x2x1
jax: 0.10.0
libtpu: 0.0.40
codegen_flags: <defaults>
</compile_context>

<pallas_src>
import jax
import jax.numpy as jnp
from jax.experimental import pallas as pl
from jax.experimental.pallas import tpu as pltpu


def _dma_copy_kernel(x_hbm_ref, o_hbm_ref, sem):
    # Whole-array HBM->HBM DMA: start, then wait.  No VMEM staging.
    cp = pltpu.make_async_copy(x_hbm_ref, o_hbm_ref, sem)
    cp.start()
    cp.wait()


def _normalize_dim(dim, ndim):
    # torch.unsqueeze accepts dim in [-(ndim+1), ndim].
    if dim < 0:
        dim += ndim + 1
    assert 0 <= dim <= ndim, f"invalid unsqueeze dim {dim} for ndim={ndim}"
    return dim


def _pallas_identity_copy(x):
    """Materializing identity copy via a single HBM->HBM DMA."""
    # DMA is shape/layout agnostic; keep x's own shape (rank >= 1).
    x_src = x.reshape((1,)) if x.ndim == 0 else x
    y = pl.pallas_call(
        _dma_copy_kernel,
        out_shape=jax.ShapeDtypeStruct(x_src.shape, x_src.dtype),
        in_specs=[pl.BlockSpec(memory_space=pl.ANY)],
        out_specs=pl.BlockSpec(memory_space=pl.ANY),
        scratch_shapes=[pltpu.SemaphoreType.DMA],
    )(x_src)
    return y


def pallas_unsqueeze(x, dim, *, materialize=False):
    """Equivalent of Unsqueeze(dim)(x) in PyTorch.

    Default: zero-cost metadata reshape (exactly what torch.unsqueeze is).
    materialize=True: force a fresh HBM buffer via a single Pallas DMA copy.
    """
    dim = _normalize_dim(dim, x.ndim)
    out_shape = x.shape[:dim] + (1,) + x.shape[dim:]

    if not materialize:
        # Pure metadata op: 0 bytes of HBM traffic.
        return x.reshape(out_shape)

    # Explicitly requested copy: one whole-array HBM->HBM DMA, then the
    # zero-cost shape relabeling.
    y = _pallas_identity_copy(x)
    return y.reshape(out_shape)


if __name__ == "__main__":
    key = jax.random.PRNGKey(0)
    # Input: NCHW like PyTorch conv activations.
    B, C, H, W = 2, 4, 16, 16
    x = jax.random.normal(key, (B, C, H, W), dtype=jnp.float32)

    # Unsqueeze(1): (2, 4, 16, 16) -> (2, 1, 4, 16, 16)
    dim = 1
    ref = jnp.expand_dims(x, dim)

    # Default (zero-copy metadata) path.
    y_meta = jax.block_until_ready(pallas_unsqueeze(x, dim))
    assert y_meta.shape == (B, 1, C, H, W), y_meta.shape
    assert y_meta.dtype == x.dtype
    assert bool(jnp.array_equal(y_meta, ref))

    # Explicit materialized path: runs the Pallas HBM->HBM DMA kernel once.
    y_copy = jax.block_until_ready(pallas_unsqueeze(x, dim, materialize=True))
    assert y_copy.shape == (B, 1, C, H, W), y_copy.shape
    assert y_copy.dtype == x.dtype
    assert bool(jnp.array_equal(y_copy, ref))

    print("KERNEL_OK")
</pallas_src>

<mosaic_0001>
module attributes {stable_mosaic.version = 11 : i64} {
  func.func @_dma_copy_kernel(%arg0: memref<2x4x16x16xf32, #tpu.memory_space<any>>, %arg1: memref<2x4x16x16xf32, #tpu.memory_space<any>>, %arg2: memref<!tpu.dma_semaphore, #tpu.memory_space<semaphore_mem>>) attributes {dimension_semantics = [], scalar_prefetch = 0 : i64, scratch_operands = 1 : i64, tpu.core_type = #tpu.core_type<tc>} {
    tpu.enqueue_dma source(%arg0 : memref<2x4x16x16xf32, #tpu.memory_space<any>>) target(%arg1 : memref<2x4x16x16xf32, #tpu.memory_space<any>>) target_semaphore(%arg2 : memref<!tpu.dma_semaphore, #tpu.memory_space<semaphore_mem>>)
    tpu.wait_dma2 semaphore(%arg2 : memref<!tpu.dma_semaphore, #tpu.memory_space<semaphore_mem>>) src(%arg0 : memref<2x4x16x16xf32, #tpu.memory_space<any>>) dst(%arg1 : memref<2x4x16x16xf32, #tpu.memory_space<any>>)
    return
  }
}

</mosaic_0001>

<bundles_post_ra>
// kernel: tpu_custom_call.1
= control target key start
LH: loop header
LB: loop body
LE: loop exit
PB: predicated region body
PF: predicated region fallthrough
CT: control target
= control target key end

     0   :  { %s36_s6 = smov [#allocation2]   ;;  %s37_s7 = smov [#allocation3]   ;;  %s55_s0 = inlined_call_operand.hbm [shape: f32[2,4,16,16], index: 0, kind: input, shape index: {}]   ;;  %s56_s1 = inlined_call_operand.hbm [shape: f32[2,4,16,16], index: 1, kind: output, shape index: {}]  }
   0x1   :  { %s38_s8 = smov 0  }
   0x2   :  { %18 = dma.general %s55_s0, 2048, %s56_s1, %s36_s6, %s37_s7, [#allocation4], %s38_s8, 0  }
   0x3   :  { %34 = dma.done.wait [#allocation2], 2048 }
   0x4   :  { %35 = vsyncadd [#allocation2], 4294965248 }
   0x5   :  { %24 = vsyncmov [#allocation2] }
   0x8   :  { %s25_s13 = vpop.sfrf %24 }
   0x9   :  { %p30_p0 = scmp.ne.s32.totalorder %s25_s13, 0 }
   0xb   :  { %29 = shalt.err (%p30_p0)  }

</bundles_post_ra>
